<compile_context>
chip_gen: v5e
topology: v5e:2x2
jax: 0.10.0
libtpu: 0.0.40
codegen_flags: <defaults>
</compile_context>

<pallas_src>
import jax
import jax.numpy as jnp
from jax.experimental import pallas as pl
from jax.experimental.pallas import tpu as pltpu

NUM_STATE = 4     # CartPole observation_space.shape[0]
NUM_ACT = 2       # CartPole action_space.n
HIDDEN = 128
LANES = 128       # lane-dense output / head width

# Row offsets inside the packed bf16 parameter slab.
_W1_OFF = 0       # rows   0..3   : W1  (NUM_STATE x 128)
_B1_OFF = 8       # rows   8..15  : b1 replicated 8x
_W2_OFF = 16      # rows  16..143 : W2  (128 x 128)          (16-row aligned)
_B2_OFF = 144     # rows 144..151 : b2 replicated 8x
_WH_OFF = 160     # rows 160..287 : folded head Wq (128x128)  (16-row aligned)
_BH_OFF = 288     # rows 288..295 : folded head bias bq replicated 8x
SLAB_ROWS = 304   # multiple of 16 (bf16 sublane tile)


def _round_up(n, m):
    return ((n + m - 1) // m) * m


def _qnet_kernel(x_ref, p_ref, o_ref):
    x = x_ref[...]                              # [TB, NUM_STATE] float32
    tb = x.shape[0]

    def bias(off):
        # Replicated bias rows: full-tile load when the batch tile is 8 rows,
        # otherwise a single row that broadcasts over sublanes.
        rows = 8 if tb == 8 else 1
        return p_ref[off:off + rows, :].astype(jnp.float32)

    # ---- layer 1: Linear(num_state, 128) + ReLU ---------------------------
    # K = NUM_STATE = 4: done as 4 rank-1 VPU updates; b1 is the accumulator
    # init, so no padded x, no separate bias add, no extra MXU matmul.
    h = bias(_B1_OFF)
    for i in range(NUM_STATE):
        w1_row = p_ref[_W1_OFF + i:_W1_OFF + i + 1, :].astype(jnp.float32)
        h = h + x[:, i:i + 1] * w1_row
    h = jnp.maximum(h, 0.0)

    # ---- layer 2: Linear(128, 128) + ReLU (bf16 MXU, f32 accumulation) ----
    w2 = p_ref[_W2_OFF:_W2_OFF + HIDDEN, :]
    h = jnp.dot(h.astype(jnp.bfloat16), w2, preferred_element_type=jnp.float32)
    h = jnp.maximum(h + bias(_B2_OFF), 0.0)

    # ---- fused dueling head (dueling combine already folded into Wq/bq) ---
    wh = p_ref[_WH_OFF:_WH_OFF + HIDDEN, :]
    q = jnp.dot(h.astype(jnp.bfloat16), wh, preferred_element_type=jnp.float32)
    # Lane-dense store: lanes 0..NUM_ACT-1 hold Q-values, lanes >= NUM_ACT are
    # exactly 0 (their weights/biases are zero in the slab).
    o_ref[...] = (q + bias(_BH_OFF)).astype(o_ref.dtype)


def pack_params(params):
    """Pack (w1,b1,w2,b2,wv,bv,wa,ba) into one [304,128] bf16 slab.

    The dueling combine is folded into the head weights/bias here (in f32,
    before the bf16 cast).
    """
    w1, b1, w2, b2, wv, bv, wa, ba = params
    b1 = b1.reshape(1, -1)
    b2 = b2.reshape(1, -1)
    bv = bv.reshape(1, -1)
    ba = ba.reshape(1, -1)

    # Fold v + (a - mean(a)) into the head weights: linear in h.
    wq = wa + wv - jnp.mean(wa, axis=1, keepdims=True)         # [128, NUM_ACT]
    bq = ba + bv - jnp.mean(ba, axis=1, keepdims=True)         # [1,   NUM_ACT]

    slab = jnp.zeros((SLAB_ROWS, LANES), jnp.float32)
    slab = slab.at[_W1_OFF:_W1_OFF + NUM_STATE, :HIDDEN].set(w1)
    slab = slab.at[_B1_OFF:_B1_OFF + 8, :HIDDEN].set(
        jnp.broadcast_to(b1, (8, HIDDEN)))
    slab = slab.at[_W2_OFF:_W2_OFF + HIDDEN, :HIDDEN].set(w2)
    slab = slab.at[_B2_OFF:_B2_OFF + 8, :HIDDEN].set(
        jnp.broadcast_to(b2, (8, HIDDEN)))
    slab = slab.at[_WH_OFF:_WH_OFF + HIDDEN, :NUM_ACT].set(wq)
    slab = slab.at[_BH_OFF:_BH_OFF + 8, :NUM_ACT].set(
        jnp.broadcast_to(bq, (8, NUM_ACT)))
    return slab.astype(jnp.bfloat16)


def qnetwork_forward_dense(x, param_slab):
    """x: [B, NUM_STATE] f32 -> lane-dense [B_pad, LANES] f32.

    Q-values live in lanes 0..NUM_ACT-1; remaining lanes are 0. Consume this
    directly downstream (mask + argmax) to avoid an extra slice HLO.
    """
    B = x.shape[0]
    tile_b = 256 if B > 256 else max(_round_up(B, 8), 8)
    B_pad = _round_up(B, tile_b)
    if B_pad != B:
        x = jnp.pad(x, ((0, B_pad - B), (0, 0)))
    grid = (B_pad // tile_b,)

    flops = 2 * B_pad * (NUM_STATE * HIDDEN + HIDDEN * HIDDEN + HIDDEN * LANES)
    bytes_accessed = param_slab.size * 2 + x.size * 4 + B_pad * LANES * 4

    out = pl.pallas_call(
        _qnet_kernel,
        out_shape=jax.ShapeDtypeStruct((B_pad, LANES), jnp.float32),
        grid_spec=pltpu.PrefetchScalarGridSpec(
            num_scalar_prefetch=0,
            grid=grid,
            in_specs=[
                pl.BlockSpec((tile_b, NUM_STATE), lambda i: (i, 0)),
                # Weights stay VMEM-resident across all batch tiles.
                pl.BlockSpec((SLAB_ROWS, LANES), lambda i: (0, 0)),
            ],
            out_specs=pl.BlockSpec((tile_b, LANES), lambda i: (i, 0)),
        ),
        compiler_params=pltpu.CompilerParams(
            dimension_semantics=("parallel",)),
        cost_estimate=pl.CostEstimate(
            flops=flops, transcendentals=0, bytes_accessed=bytes_accessed),
    )(x, param_slab)
    return out


def q_values(x, param_slab):
    """Convenience wrapper matching the PyTorch module: [B,num_state]->[B,num_act]."""
    B = x.shape[0]
    return qnetwork_forward_dense(x, param_slab)[:B, :NUM_ACT]


def init_params(key):
    """Deterministic synthetic parameters (PyTorch-Linear-like uniform init)."""
    ks = jax.random.split(key, 8)

    def lin(kw, kb, fan_in, fan_out):
        bound = 1.0 / jnp.sqrt(jnp.float32(fan_in))
        # weight stored as [in, out] (transpose of torch's [out, in])
        w = jax.random.uniform(kw, (fan_in, fan_out), jnp.float32, -bound, bound)
        b = jax.random.uniform(kb, (1, fan_out), jnp.float32, -bound, bound)
        return w, b

    w1, b1 = lin(ks[0], ks[1], NUM_STATE, HIDDEN)
    w2, b2 = lin(ks[2], ks[3], HIDDEN, HIDDEN)
    wv, bv = lin(ks[4], ks[5], HIDDEN, 1)
    wa, ba = lin(ks[6], ks[7], HIDDEN, NUM_ACT)
    return (w1, b1, w2, b2, wv, bv, wa, ba)


def _reference_forward(x, params):
    """Pure-JAX f32 reference of the same forward pass."""
    w1, b1, w2, b2, wv, bv, wa, ba = params
    h = jnp.maximum(x @ w1 + b1, 0.0)
    h = jnp.maximum(h @ w2 + b2, 0.0)
    v = h @ wv + bv
    a = h @ wa + ba
    return v + (a - a.mean(axis=1, keepdims=True))


if __name__ == "__main__":
    key = jax.random.PRNGKey(0)
    k_params, k_x = jax.random.split(key)

    params = init_params(k_params)
    slab = pack_params(params)
    # Small demo batch; in a training loop the whole replay minibatch / all
    # parallel envs should be batched into one call to amortize per-call cost.
    x = jax.random.normal(k_x, (8, NUM_STATE), dtype=jnp.float32)

    q = q_values(x, slab)
    q = jax.block_until_ready(q)

    ref = _reference_forward(x, params)
    assert q.shape == (8, NUM_ACT)
    # bf16 weights/activations into the MXU -> loosened tolerance vs f32 ref.
    assert jnp.allclose(q, ref, atol=3e-2, rtol=3e-2)

    print("KERNEL_OK")
</pallas_src>

<mosaic_0001>
module attributes {stable_mosaic.version = 11 : i64} {
  func.func @_qnet_kernel(%arg0: i32, %arg1: memref<8x4xf32, #tpu.memory_space<vmem>>, %arg2: memref<304x128xbf16, #tpu.memory_space<vmem>>, %arg3: memref<8x128xf32, #tpu.memory_space<vmem>>) attributes {dimension_semantics = [#tpu.dimension_semantics<parallel>], iteration_bounds = array<i64: 1>, scalar_prefetch = 0 : i64, scratch_operands = 0 : i64, tpu.core_type = #tpu.core_type<tc>, window_params = [{transform_indices = @transform_0, window_bounds = array<i64: 8, 4>}, {pipeline_mode = #tpu.pipeline_mode<synchronous>, transform_indices = @transform_1, window_bounds = array<i64: 304, 128>}, {transform_indices = @transform_2, window_bounds = array<i64: 8, 128>}]} {
    %c0 = arith.constant 0 : index
    %c0_0 = arith.constant 0 : index
    %0 = vector.load %arg1[%c0, %c0_0] : memref<8x4xf32, #tpu.memory_space<vmem>>, vector<8x4xf32>
    %c8 = arith.constant 8 : index
    %c0_1 = arith.constant 0 : index
    %1 = vector.load %arg2[%c8, %c0_1] : memref<304x128xbf16, #tpu.memory_space<vmem>>, vector<8x128xbf16>
    %2 = arith.extf %1 : vector<8x128xbf16> to vector<8x128xf32>
    %c0_2 = arith.constant 0 : index
    %c0_3 = arith.constant 0 : index
    %3 = vector.load %arg2[%c0_2, %c0_3] : memref<304x128xbf16, #tpu.memory_space<vmem>>, vector<1x128xbf16>
    %4 = arith.extf %3 : vector<1x128xbf16> to vector<1x128xf32>
    %5 = vector.extract_strided_slice %0 {offsets = [0, 0], sizes = [8, 1], strides = [1, 1]} : vector<8x4xf32> to vector<8x1xf32>
    %6 = vector.broadcast %5 : vector<8x1xf32> to vector<8x128xf32>
    %7 = vector.broadcast %4 : vector<1x128xf32> to vector<8x128xf32>
    %8 = arith.mulf %6, %7 : vector<8x128xf32>
    %9 = arith.addf %2, %8 : vector<8x128xf32>
    %c1 = arith.constant 1 : index
    %c0_4 = arith.constant 0 : index
    %10 = vector.load %arg2[%c1, %c0_4] : memref<304x128xbf16, #tpu.memory_space<vmem>>, vector<1x128xbf16>
    %11 = arith.extf %10 : vector<1x128xbf16> to vector<1x128xf32>
    %12 = vector.extract_strided_slice %0 {offsets = [0, 1], sizes = [8, 1], strides = [1, 1]} : vector<8x4xf32> to vector<8x1xf32>
    %13 = vector.broadcast %12 : vector<8x1xf32> to vector<8x128xf32>
    %14 = vector.broadcast %11 : vector<1x128xf32> to vector<8x128xf32>
    %15 = arith.mulf %13, %14 : vector<8x128xf32>
    %16 = arith.addf %9, %15 : vector<8x128xf32>
    %c2 = arith.constant 2 : index
    %c0_5 = arith.constant 0 : index
    %17 = vector.load %arg2[%c2, %c0_5] : memref<304x128xbf16, #tpu.memory_space<vmem>>, vector<1x128xbf16>
    %18 = arith.extf %17 : vector<1x128xbf16> to vector<1x128xf32>
    %19 = vector.extract_strided_slice %0 {offsets = [0, 2], sizes = [8, 1], strides = [1, 1]} : vector<8x4xf32> to vector<8x1xf32>
    %20 = vector.broadcast %19 : vector<8x1xf32> to vector<8x128xf32>
    %21 = vector.broadcast %18 : vector<1x128xf32> to vector<8x128xf32>
    %22 = arith.mulf %20, %21 : vector<8x128xf32>
    %23 = arith.addf %16, %22 : vector<8x128xf32>
    %c3 = arith.constant 3 : index
    %c0_6 = arith.constant 0 : index
    %24 = vector.load %arg2[%c3, %c0_6] : memref<304x128xbf16, #tpu.memory_space<vmem>>, vector<1x128xbf16>
    %25 = arith.extf %24 : vector<1x128xbf16> to vector<1x128xf32>
    %26 = vector.extract_strided_slice %0 {offsets = [0, 3], sizes = [8, 1], strides = [1, 1]} : vector<8x4xf32> to vector<8x1xf32>
    %27 = vector.broadcast %26 : vector<8x1xf32> to vector<8x128xf32>
    %28 = vector.broadcast %25 : vector<1x128xf32> to vector<8x128xf32>
    %29 = arith.mulf %27, %28 : vector<8x128xf32>
    %30 = arith.addf %23, %29 : vector<8x128xf32>
    %cst = arith.constant 0.000000e+00 : f32
    %31 = vector.broadcast %cst : f32 to vector<8x128xf32>
    %32 = arith.maximumf %30, %31 : vector<8x128xf32>
    %c16 = arith.constant 16 : index
    %c0_7 = arith.constant 0 : index
    %33 = vector.load %arg2[%c16, %c0_7] : memref<304x128xbf16, #tpu.memory_space<vmem>>, vector<128x128xbf16>
    %34 = arith.truncf %32 : vector<8x128xf32> to vector<8x128xbf16>
    %cst_8 = arith.constant dense<0.000000e+00> : vector<8x128xf32>
    %35 = tpu.matmul %34, %33, %cst_8 {dimension_numbers = #tpu.dot_dimension_numbers<[1], [0], [0], [1], [0, 0, 1, 1], [], []>} : vector<8x128xbf16>, vector<128x128xbf16>, vector<8x128xf32> -> vector<8x128xf32>
    %c144 = arith.constant 144 : index
    %c0_9 = arith.constant 0 : index
    %36 = vector.load %arg2[%c144, %c0_9] : memref<304x128xbf16, #tpu.memory_space<vmem>>, vector<8x128xbf16>
    %37 = arith.extf %36 : vector<8x128xbf16> to vector<8x128xf32>
    %38 = arith.addf %35, %37 : vector<8x128xf32>
    %cst_10 = arith.constant 0.000000e+00 : f32
    %39 = vector.broadcast %cst_10 : f32 to vector<8x128xf32>
    %40 = arith.maximumf %38, %39 : vector<8x128xf32>
    %c160 = arith.constant 160 : index
    %c0_11 = arith.constant 0 : index
    %41 = vector.load %arg2[%c160, %c0_11] : memref<304x128xbf16, #tpu.memory_space<vmem>>, vector<128x128xbf16>
    %42 = arith.truncf %40 : vector<8x128xf32> to vector<8x128xbf16>
    %cst_12 = arith.constant dense<0.000000e+00> : vector<8x128xf32>
    %43 = tpu.matmul %42, %41, %cst_12 {dimension_numbers = #tpu.dot_dimension_numbers<[1], [0], [0], [1], [0, 0, 1, 1], [], []>} : vector<8x128xbf16>, vector<128x128xbf16>, vector<8x128xf32> -> vector<8x128xf32>
    %c288 = arith.constant 288 : index
    %c0_13 = arith.constant 0 : index
    %44 = vector.load %arg2[%c288, %c0_13] : memref<304x128xbf16, #tpu.memory_space<vmem>>, vector<8x128xbf16>
    %45 = arith.extf %44 : vector<8x128xbf16> to vector<8x128xf32>
    %46 = arith.addf %43, %45 : vector<8x128xf32>
    %c0_14 = arith.constant 0 : index
    %c0_15 = arith.constant 0 : index
    %47 = vector.load %arg3[%c0_14, %c0_15] : memref<8x128xf32, #tpu.memory_space<vmem>>, vector<8x128xf32>
    tpu.vector_store %arg3[%c0_14, %c0_15], %46 {strides = array<i32>} : memref<8x128xf32, #tpu.memory_space<vmem>>, vector<8x128xf32>,
    return
  }
  func.func @transform_0(%arg0: i32) -> (i32, i32) {
    %c0_i32 = arith.constant 0 : i32
    %c0_i32_0 = arith.constant 0 : i32
    return %arg0, %c0_i32 : i32, i32
  }
  func.func @transform_1(%arg0: i32) -> (i32, i32) {
    %c0_i32 = arith.constant 0 : i32
    %c0_i32_0 = arith.constant 0 : i32
    %c0_i32_1 = arith.constant 0 : i32
    return %c0_i32, %c0_i32_0 : i32, i32
  }
  func.func @transform_2(%arg0: i32) -> (i32, i32) {
    %c0_i32 = arith.constant 0 : i32
    %c0_i32_0 = arith.constant 0 : i32
    return %arg0, %c0_i32 : i32, i32
  }
}

</mosaic_0001>

<bundles_post_ra>
// kernel: tpu_custom_call.1
= control target key start
LH: loop header
LB: loop body
LE: loop exit
PB: predicated region body
PF: predicated region fallthrough
CT: control target
= control target key end

     0   :  { %7 = vsyncpa [#allocation3], 0  ;;  %s421_s0 = inlined_call_operand.vmem [shape: f32[8,4], index: 0, kind: input, shape index: {}]   ;;  %s422_s1 = inlined_call_operand.hbm [shape: bf16[304,128], index: 1, kind: input, shape index: {}]   ;;  %s423_s2 = inlined_call_operand.hbm [shape: f32[8,128], index: 2, kind: output, shape index: {}]  }
   0x1   :  { %8 = vsyncpa [#allocation4], 0  ;;  %s15_s11 = sshll.u32 %s422_s1, 4  ;;  %s389_s12 = smov [#allocation2]   ;;  %s16_s11 = int_to_ptr.hbm [resolvable:$true] %s15_s11 }
   0x2   :  { %s17_s13 = sshll.u32 %s389_s12, 4  ;;  %s390_s14 = smov 64   ;;  %s18_s13 = int_to_ptr.vmem [resolvable:$true] %s17_s13 }
   0x3   :  { %s391_s15 = smov 4  }
   0x4   :  { %23 = dma.hbm_to_vmem [thread:$0]  %s16_s11, 2432, %s18_s13, [#allocation3], %s390_s14, %s390_s14, %s391_s15  }
   0x5   :  { %385 = dma.done.wait [#allocation3], 2432  }
   0x6   :  { %386 = vsyncadd [#allocation3], 4294964864  ;;  %v392_v0 = vmov 0   ;;  %v393_v1 = vmov 2   ;;  %v28_v2 = vld [vmem:[%s421_s0] sm:$0xff]  ;;  %v314_v4 = vld [vmem:[#allocation2 + $0x38] sm:$0xff] }
   0x7   :  { %332 = vset.pattern.permute.xlu0 %v392_v0  ;;  %334 = vset.pattern.permute.xlu1 %v393_v1  ;;  %v315_v3 = vld [vmem:[#allocation2 + $0x40] sm:$0xff]  ;;  %v313_v5 = vld [vmem:[#allocation2 + $0x30] sm:$0xff]  ;;  %v394_v6 = vmov 1   ;;  %v395_v7 = vmov 3   ;;  %v312_v8 = vld [vmem:[#allocation2 + $0x28] sm:$0xff]  ;;  %s396_s0 = smov [#allocation5]  }
   0x8   :  { %35 = vperm.xlu0 %332, %v28_v2   ;;  %51 = vperm.xlu1 %334, %v28_v2   ;;  %v311_v9 = vld [vmem:[#allocation2 + $0x20] sm:$0xff]  ;;  %v310_v10 = vld [vmem:[#allocation2 + $0x18] sm:$0xff]  ;;  %v309_v11 = vld [vmem:[#allocation2 + $0x10] sm:$0xff]  ;;  %s232_s1 = sshll.u32 %s396_s0, 4  ;;  %s234_s20 = sshll.u32 %s423_s2, 4  ;;  %s233_s1 = int_to_ptr.vmem [resolvable:$true] %s232_s1  ;;  %s235_s20 = int_to_ptr.hbm [resolvable:$true] %s234_s20 }
   0x9   :  { %132 = vmatpush.bf16.msra.mxu0 %v315_v3  ;;  %v308_v12 = vld [vmem:[#allocation2 + $0x8] sm:$0xff]  ;;  %v322_v14 = vld [vmem:[#allocation2 + $0x80] sm:$0xff]  ;;  %v321_v16 = vld [vmem:[#allocation2 + $0x78] sm:$0xff] }
   0xa   :  { %v323_v13 = vld [vmem:[#allocation2 + $0x88] sm:$0xff]  ;;  %v31_v15 = vld [vmem:[#allocation2] sm:$0x1]  ;;  %v320_v20 = vld [vmem:[#allocation2 + $0x70] sm:$0xff] }
   0xb   :  { %213 = vmatpush.bf16.msra.mxu1 %v323_v13  ;;  %v32_v17 = vunpack.c.l.bf16 %v31_v15  ;;  %v48_v21 = vld [vmem:[#allocation2] sm:$0x2]  ;;  %v29_v23 = vld [vmem:[#allocation2 + $0x4] sm:$0xf]  ;;  %v319_v25 = vld [vmem:[#allocation2 + $0x68] sm:$0xff] }
   0xc   :  { %v49_v24 = vunpack.c.l.bf16 %v48_v21  ;;  %v30_v26 = vunpack.c.l.bf16 %v29_v23  ;;  %v318_v31 = vld [vmem:[#allocation2 + $0x60] sm:$0xff]  ;;  %v317_v43 = vld [vmem:[#allocation2 + $0x58] sm:$0xff]  ;;  %v316_v44 = vld [vmem:[#allocation2 + $0x50] sm:$0xff] }
   0xd   :  { %133 = vmatpush.bf16.msra.mxu0 %v314_v4  ;;  %v38_v22 = vperm.slane %v32_v17, 0  ;;  %v45_v28 = vperm.slane %v32_v17, 1  ;;  %v82_v45 = vld [vmem:[#allocation2 + $0x48] sm:$0xf]  ;;  %v163_v52 = vld [vmem:[#allocation2 + $0x90] sm:$0xf] }
   0xe   :  { %v54_v29 = vperm.slane %v49_v24, 2  ;;  %v61_v30 = vperm.slane %v49_v24, 3  ;;  %v83_v46 = vunpack.c.l.bf16 %v82_v45  ;;  %v164_v53 = vunpack.c.l.bf16 %v163_v52 }
   0xf   :  { %214 = vmatpush.bf16.msra.mxu1 %v322_v14 }
  0x10   :  { %333 = vset.pattern.permute.xlu0 %v394_v6  ;;  %335 = vset.pattern.permute.xlu1 %v395_v7 }
  0x11   :  { %42 = vperm.xlu0 %333, %v28_v2   ;;  %58 = vperm.xlu1 %335, %v28_v2  }
  0x12   :  { %134 = vmatpush.bf16.msra.mxu0 %v313_v5 }
  0x13   :  { %215 = vmatpush.bf16.msra.mxu1 %v321_v16 }
  0x16   :  { %135 = vmatpush.bf16.msra.mxu0 %v312_v8 }
  0x17   :  { %216 = vmatpush.bf16.msra.mxu1 %v320_v20 }
  0x19   :  { %336 = vset.pattern.permute.xlu0 %v395_v7 }
  0x1a   :  { %136 = vmatpush.bf16.msra.mxu0 %v311_v9 }
  0x1b   :  { %217 = vmatpush.bf16.msra.mxu1 %v319_v25 }
  0x1e   :  { %137 = vmatpush.bf16.msra.mxu0 %v310_v10 }
  0x1f   :  { %218 = vmatpush.bf16.msra.mxu1 %v318_v31 }
  0x22   :  { %138 = vmatpush.bf16.msra.mxu0 %v309_v11 }
  0x23   :  { %219 = vmatpush.bf16.msra.mxu1 %v317_v43 }
  0x26   :  { %139 = vmatpush.bf16.msra.mxu0 %v308_v12 }
  0x27   :  { %220 = vmatpush.bf16.msra.mxu1 %v316_v44 }
  0x7a   :  { %v36_v18 = vpop.permute.xlu0 %35  ;;  %v52_v19 = vpop.permute.xlu1 %51 }
  0x7b   :  { %v39_v27 = vmul.f32 %v38_v22, %v36_v18  ;;  %v55_v36 = vmul.f32 %v54_v29, %v52_v19 }
  0x7d   :  { %v40_v34 = vadd.f32 %v39_v27, %v30_v26 }
  0x83   :  { %v43_v32 = vpop.permute.xlu0 %42  ;;  %v59_v33 = vpop.permute.xlu1 %58 }
  0x84   :  { %v46_v35 = vmul.f32 %v45_v28, %v43_v32  ;;  %v62_v38 = vmul.f32 %v61_v30, %v59_v33 }
  0x86   :  { %v47_v37 = vadd.f32 %v46_v35, %v40_v34 }
  0x88   :  { %v56_v39 = vadd.f32 %v55_v36, %v47_v37 }
  0x8a   :  { %v63_v40 = vadd.f32 %v62_v38, %v56_v39 }
  0x8c   :  { %v64_v41 = vmax.f32 %v63_v40, 0.0 }
  0x8e   :  { %v81_v42 = vpack.c.bf16 %v64_v41, %v64_v41 }
  0x90   :  { %140 = vmatmul.bf16.vlgmr.msra.gmra.mxu0 %v81_v42 }
 0x10d   :  { %v141_v47 = vpop.f32.mrf.mxu0 }
 0x10e   :  { %v142_v48 = vadd.f32 %v141_v47, %v83_v46 }
 0x110   :  { %v145_v49 = vmax.f32 %v142_v48, 0.0 }
 0x112   :  { %v162_v50 = vpack.c.bf16 %v145_v49, %v145_v49 }
 0x114   :  { %221 = vmatmul.bf16.vlgmr.msra.gmra.mxu1 %v162_v50 }
 0x115   :  { %v143_v51 = vpop.f32.mrf.mxu0 }
 0x191   :  { %v222_v54 = vpop.f32.mrf.mxu1 }
 0x192   :  { %v223_v55 = vadd.f32 %v222_v54, %v164_v53 }
 0x194   :  { %226 = vst [vmem:[#allocation5] sm:$0xff] %v223_v55 }
 0x195   :  { %237 = dma.vmem_to_hbm [thread:$0]  %s233_s1, 128, %s235_s20, [#allocation4]  }
 0x199   :  { %v224_v56 = vpop.f32.mrf.mxu1 }
 0x19a   :  { %387 = dma.done.wait [#allocation4], 128  }
 0x19b   :  { %388 = vsyncadd [#allocation4], 4294967168 }
 0x19c   :  { %242 = vsyncpa [#allocation3], 1 }
 0x19d   :  { %243 = vsyncpa [#allocation4], 1 }

</bundles_post_ra>
